<compile_context>
chip_gen: v7x
topology: tpu7x:2x2x1
jax: 0.10.0
libtpu: 0.0.40
codegen_flags: <defaults>
</compile_context>

<pallas_src>
import math

import jax
import jax.numpy as jnp
from jax.experimental import pallas as pl
from jax.experimental.pallas import tpu as pltpu

_MIB = 1024 * 1024
_VMEM_BUDGET = 40 * _MIB          # conservative: fits v5e/v6e/v7x
_VMEM_LIMIT_CAP = 48 * _MIB
_KBLOCK_THRESHOLD = 4096          # input_size above this -> K-blocked path
_TK = 512                         # K tile for the K-blocked path


def _round_up(x, m):
    return ((x + m - 1) // m) * m


def _sublane_multiple(dtype):
    # min sublane tile: 8 for 4-byte, 16 for 2-byte, 32 for 1-byte dtypes
    return {4: 8, 2: 16, 1: 32}.get(jnp.dtype(dtype).itemsize, 8)


def _pick_lane_tile(size, candidates):
    """Lane-dim tile minimizing padding; ties broken toward the larger tile."""
    best_tile, best_padded = None, None
    for c in candidates:  # candidates given in descending order
        padded = _round_up(size, c)
        if best_padded is None or padded < best_padded:
            best_tile, best_padded = c, padded
    return best_tile, best_padded


def _pick_batch_tile(batch, sub, cap=512):
    if batch <= cap:
        return _round_up(batch, sub)          # single block, minimal padding
    for t in (512, 384, 256, 128):            # prefer a divisor: no batch pad
        if t % sub == 0 and batch % t == 0:
            return t
    return _round_up(cap, sub)


def _vmem_limit(estimate_bytes):
    return int(min(_VMEM_LIMIT_CAP, max(estimate_bytes * 5 // 4, 16 * _MIB)))


# ---------------------------------------------------------------------------
# Kernels
# ---------------------------------------------------------------------------
def _dense_kernel(d_ref, wt_ref, b_ref, o_ref):
    # d: (tm, K), wt: (K, tn|N), b: (1, tn) -> o: (tm, tn)
    z = jnp.dot(d_ref[...], wt_ref[...], preferred_element_type=jnp.float32)
    z = z + b_ref[...].astype(jnp.float32)
    o_ref[...] = jnp.exp(-jnp.maximum(z, 0.0)).astype(o_ref.dtype)


def _dense_kblock_kernel(d_ref, wt_ref, b_ref, o_ref, acc_ref):
    # Accumulate over the K grid axis (last, "arbitrary"); finalize on last k.
    k = pl.program_id(2)

    @pl.when(k == 0)
    def _():
        acc_ref[...] = jnp.zeros_like(acc_ref)

    acc_ref[...] += jnp.dot(d_ref[...], wt_ref[...],
                            preferred_element_type=jnp.float32)

    @pl.when(k == pl.num_programs(2) - 1)
    def _():
        z = acc_ref[...] + b_ref[...].astype(jnp.float32)
        o_ref[...] = jnp.exp(-jnp.maximum(z, 0.0)).astype(o_ref.dtype)


def _diag_kernel(d_ref, w_ref, b_ref, o_ref):
    # gamma = exp(-relu(d * diag(W) + b)) -- pure elementwise (VPU + EUP).
    z = (d_ref[...].astype(jnp.float32) * w_ref[...].astype(jnp.float32)
         + b_ref[...].astype(jnp.float32))
    o_ref[...] = jnp.exp(-jnp.maximum(z, 0.0)).astype(o_ref.dtype)


# ---------------------------------------------------------------------------
# One-time parameter preprocessing + per-call apply
# ---------------------------------------------------------------------------
def make_temporal_decay(W, b, diag=False):
    """Preprocess parameters once; returns apply(d) -> gamma.

    W: (output_size, input_size)   (torch F.linear layout)
    b: (output_size,)
    """
    output_size, input_size = W.shape

    if diag:
        assert input_size == output_size
        tn, np_ = _pick_lane_tile(output_size, (1024, 512, 256, 128))
        w_diag = jnp.diagonal(W).reshape(1, output_size)
        b2d = b.reshape(1, output_size)
        pad_n = np_ - output_size
        w_p = jnp.pad(w_diag, ((0, 0), (0, pad_n))) if pad_n else w_diag
        b_p = jnp.pad(b2d, ((0, 0), (0, pad_n))) if pad_n else b2d

        # TODO(synk): the diag path is a pure elementwise fusion; if the
        # consumer is JAX code, fusing it there (no Pallas boundary) saves one
        # HBM round trip of gamma.
        def apply(d):
            batch, k_in = d.shape
            assert k_in == input_size
            dsz = jnp.dtype(d.dtype).itemsize
            sub = _sublane_multiple(d.dtype)
            tm = _pick_batch_tile(batch, sub)
            bp = _round_up(batch, tm)
            d_p = d
            if bp != batch or np_ != output_size:
                d_p = jnp.pad(d, ((0, bp - batch), (0, np_ - output_size)))
            grid = (bp // tm, np_ // tn)
            est = 2 * (2 * tm * tn + 2 * tn) * dsz
            cost = pl.CostEstimate(
                flops=2 * bp * np_,
                transcendentals=bp * np_,
                bytes_accessed=2 * bp * np_ * dsz + 2 * np_ * dsz,
            )
            out = pl.pallas_call(
                _diag_kernel,
                out_shape=jax.ShapeDtypeStruct((bp, np_), d.dtype),
                grid_spec=pltpu.PrefetchScalarGridSpec(
                    num_scalar_prefetch=0,
                    grid=grid,
                    in_specs=[
                        pl.BlockSpec((tm, tn), lambda i, j: (i, j)),
                        pl.BlockSpec((1, tn), lambda i, j: (0, j)),
                        pl.BlockSpec((1, tn), lambda i, j: (0, j)),
                    ],
                    out_specs=pl.BlockSpec((tm, tn), lambda i, j: (i, j)),
                ),
                compiler_params=pltpu.CompilerParams(
                    dimension_semantics=("parallel", "parallel"),
                    vmem_limit_bytes=_vmem_limit(est)),
                cost_estimate=cost,
            )(d_p, w_p, b_p)
            return out[:batch, :output_size]

        return apply

    # ----- dense path -----
    tn, np_ = _pick_lane_tile(output_size, (512, 256, 128))
    kblock = input_size > _KBLOCK_THRESHOLD
    kp = _round_up(input_size, _TK if kblock else 128)

    wt = W.T                                   # one-time (K, N) layout for MXU
    b2d = b.reshape(1, output_size)
    pad_k, pad_n = kp - input_size, np_ - output_size
    wt_p = jnp.pad(wt, ((0, pad_k), (0, pad_n))) if (pad_k or pad_n) else wt
    b_p = jnp.pad(b2d, ((0, 0), (0, pad_n))) if pad_n else b2d
    wsz = jnp.dtype(wt_p.dtype).itemsize

    def apply(d):
        batch, k_in = d.shape
        assert k_in == input_size
        dsz = jnp.dtype(d.dtype).itemsize
        sub = _sublane_multiple(d.dtype)
        tm = _pick_batch_tile(batch, sub)
        bp = _round_up(batch, tm)

        d_p = d
        if bp != batch or kp != input_size:
            # NOTE: the zero pad on the contraction (K) axis is required for
            # correctness; only the batch pad is avoidable via tile choice.
            d_p = jnp.pad(d, ((0, bp - batch), (0, kp - input_size)))

        gb, gn = bp // tm, np_ // tn
        cost = pl.CostEstimate(
            flops=2 * bp * kp * np_,
            transcendentals=bp * np_,
            bytes_accessed=(bp * kp + bp * np_) * dsz + kp * np_ * wsz + np_ * dsz,
        )

        if kblock:
            gk = kp // _TK
            est = (2 * (tm * _TK + tm * tn + tn) * dsz
                   + 2 * _TK * tn * wsz + tm * tn * 4)
            grid_spec = pltpu.PrefetchScalarGridSpec(
                num_scalar_prefetch=0,
                grid=(gb, gn, gk),
                in_specs=[
                    pl.BlockSpec((tm, _TK), lambda i, j, k: (i, k)),
                    pl.BlockSpec((_TK, tn), lambda i, j, k: (k, j)),
                    pl.BlockSpec((1, tn), lambda i, j, k: (0, j)),
                ],
                out_specs=pl.BlockSpec((tm, tn), lambda i, j, k: (i, j)),
                scratch_shapes=[pltpu.VMEM((tm, tn), jnp.float32)],
            )
            dims = ("parallel", "parallel", "arbitrary")
            kernel = _dense_kblock_kernel
        else:
            # Prefer keeping the whole weight resident in VMEM (fetched once).
            resident = (2 * (tm * kp + tm * tn + tn) * dsz
                        + 2 * kp * np_ * wsz)
            if resident <= _VMEM_BUDGET:
                est = resident
                grid_spec = pltpu.PrefetchScalarGridSpec(
                    num_scalar_prefetch=0,
                    grid=(gb, gn),
                    in_specs=[
                        pl.BlockSpec((tm, kp), lambda i, j: (i, 0)),
                        pl.BlockSpec((kp, np_), lambda i, j: (0, 0)),
                        pl.BlockSpec((1, tn), lambda i, j: (0, j)),
                    ],
                    out_specs=pl.BlockSpec((tm, tn), lambda i, j: (i, j)),
                )
            else:
                # Swap grid: batch innermost -> weight block index constant
                # across the inner loop (fetched once per output tile).
                est = (2 * (tm * kp + tm * tn + tn) * dsz
                       + 2 * kp * tn * wsz)
                grid_spec = pltpu.PrefetchScalarGridSpec(
                    num_scalar_prefetch=0,
                    grid=(gn, gb),
                    in_specs=[
                        pl.BlockSpec((tm, kp), lambda j, i: (i, 0)),
                        pl.BlockSpec((kp, tn), lambda j, i: (0, j)),
                        pl.BlockSpec((1, tn), lambda j, i: (0, j)),
                    ],
                    out_specs=pl.BlockSpec((tm, tn), lambda j, i: (i, j)),
                )
            dims = ("parallel", "parallel")
            kernel = _dense_kernel

        out = pl.pallas_call(
            kernel,
            out_shape=jax.ShapeDtypeStruct((bp, np_), d.dtype),
            grid_spec=grid_spec,
            compiler_params=pltpu.CompilerParams(
                dimension_semantics=dims,
                vmem_limit_bytes=_vmem_limit(est)),
            cost_estimate=cost,
        )(d_p, wt_p, b_p)
        return out[:batch, :output_size]

    return apply


def temporal_decay(d, W, b, diag=False):
    """Convenience one-shot wrapper (parameter glue NOT hoisted)."""
    return make_temporal_decay(W, b, diag=diag)(d)


def _reference(d, W, b, diag=False):
    if diag:
        W = W * jnp.eye(W.shape[0], dtype=W.dtype)
    z = d @ W.T + b
    return jnp.exp(-jnp.maximum(z, 0.0))


if __name__ == "__main__":
    key = jax.random.PRNGKey(0)
    k_d, k_w, k_b, k_d2, k_w2, k_b2 = jax.random.split(key, 6)

    ok = True

    # Case 1: square, small (valid for diag=True and diag=False).
    batch, input_size, output_size = 8, 32, 32
    stdv = 1.0 / math.sqrt(output_size)
    W = jax.random.uniform(k_w, (output_size, input_size), jnp.float32,
                           minval=-stdv, maxval=stdv)
    b = jax.random.uniform(k_b, (output_size,), jnp.float32,
                           minval=-stdv, maxval=stdv)
    d = jax.random.uniform(k_d, (batch, input_size), jnp.float32,
                           minval=0.0, maxval=5.0)
    for diag in (False, True):
        fn = make_temporal_decay(W, b, diag=diag)
        gamma = jax.block_until_ready(fn(d))
        ref = _reference(d, W, b, diag=diag)
        ok &= bool(jnp.allclose(gamma, ref, atol=1e-5, rtol=1e-5))

    # Case 2: non-multiple shapes (exercise padding + multi-block grid).
    batch2, in2, out2 = 48, 200, 130
    stdv2 = 1.0 / math.sqrt(out2)
    W2 = jax.random.uniform(k_w2, (out2, in2), jnp.float32,
                            minval=-stdv2, maxval=stdv2)
    b2 = jax.random.uniform(k_b2, (out2,), jnp.float32,
                            minval=-stdv2, maxval=stdv2)
    d2 = jax.random.uniform(k_d2, (batch2, in2), jnp.float32,
                            minval=0.0, maxval=5.0)
    gamma2 = jax.block_until_ready(temporal_decay(d2, W2, b2, diag=False))
    ref2 = _reference(d2, W2, b2, diag=False)
    ok &= bool(jnp.allclose(gamma2, ref2, atol=1e-5, rtol=1e-5))

    if ok:
        print("KERNEL_OK")
</pallas_src>

<mosaic_0001>
module attributes {stable_mosaic.version = 11 : i64} {
  func.func @_dense_kernel(%arg0: i32, %arg1: i32, %arg2: memref<8x128xf32, #tpu.memory_space<vmem>>, %arg3: memref<128x128xf32, #tpu.memory_space<vmem>>, %arg4: memref<1x128xf32, #tpu.memory_space<vmem>>, %arg5: memref<8x128xf32, #tpu.memory_space<vmem>>) attributes {dimension_semantics = [#tpu.dimension_semantics<parallel>, #tpu.dimension_semantics<parallel>], iteration_bounds = array<i64: 1, 1>, scalar_prefetch = 0 : i64, scratch_operands = 0 : i64, tpu.core_type = #tpu.core_type<tc>, window_params = [{transform_indices = @transform_0, window_bounds = array<i64: 8, 128>}, {pipeline_mode = #tpu.pipeline_mode<synchronous>, transform_indices = @transform_1, window_bounds = array<i64: 128, 128>}, {transform_indices = @transform_2, window_bounds = array<i64: 1, 128>}, {transform_indices = @transform_3, window_bounds = array<i64: 8, 128>}]} {
    %c0 = arith.constant 0 : index
    %c0_0 = arith.constant 0 : index
    %0 = vector.load %arg2[%c0, %c0_0] : memref<8x128xf32, #tpu.memory_space<vmem>>, vector<8x128xf32>
    %c0_1 = arith.constant 0 : index
    %c0_2 = arith.constant 0 : index
    %1 = vector.load %arg3[%c0_1, %c0_2] : memref<128x128xf32, #tpu.memory_space<vmem>>, vector<128x128xf32>
    %cst = arith.constant dense<0.000000e+00> : vector<8x128xf32>
    %2 = tpu.matmul %0, %1, %cst {dimension_numbers = #tpu.dot_dimension_numbers<[1], [0], [0], [1], [0, 0, 1, 1], [], []>} : vector<8x128xf32>, vector<128x128xf32>, vector<8x128xf32> -> vector<8x128xf32>
    %c0_3 = arith.constant 0 : index
    %c0_4 = arith.constant 0 : index
    %3 = vector.load %arg4[%c0_3, %c0_4] : memref<1x128xf32, #tpu.memory_space<vmem>>, vector<1x128xf32>
    %4 = vector.broadcast %3 : vector<1x128xf32> to vector<8x128xf32>
    %5 = arith.addf %2, %4 : vector<8x128xf32>
    %cst_5 = arith.constant 0.000000e+00 : f32
    %6 = vector.broadcast %cst_5 : f32 to vector<8x128xf32>
    %7 = arith.maximumf %5, %6 : vector<8x128xf32>
    %cst_6 = arith.constant 0.000000e+00 : f32
    %8 = vector.broadcast %cst_6 : f32 to vector<8x128xf32>
    %9 = arith.subf %8, %7 : vector<8x128xf32>
    %10 = math.exp %9 : vector<8x128xf32>
    %c0_7 = arith.constant 0 : index
    %c0_8 = arith.constant 0 : index
    %11 = vector.load %arg5[%c0_7, %c0_8] : memref<8x128xf32, #tpu.memory_space<vmem>>, vector<8x128xf32>
    tpu.vector_store %arg5[%c0_7, %c0_8], %10 {strides = array<i32>} : memref<8x128xf32, #tpu.memory_space<vmem>>, vector<8x128xf32>,
    return
  }
  func.func @transform_0(%arg0: i32, %arg1: i32) -> (i32, i32) {
    %c0_i32 = arith.constant 0 : i32
    %c0_i32_0 = arith.constant 0 : i32
    return %arg0, %c0_i32 : i32, i32
  }
  func.func @transform_1(%arg0: i32, %arg1: i32) -> (i32, i32) {
    %c0_i32 = arith.constant 0 : i32
    %c0_i32_0 = arith.constant 0 : i32
    %c0_i32_1 = arith.constant 0 : i32
    return %c0_i32, %c0_i32_0 : i32, i32
  }
  func.func @transform_2(%arg0: i32, %arg1: i32) -> (i32, i32) {
    %c0_i32 = arith.constant 0 : i32
    %c0_i32_0 = arith.constant 0 : i32
    return %c0_i32, %arg1 : i32, i32
  }
  func.func @transform_3(%arg0: i32, %arg1: i32) -> (i32, i32) {
    %c0_i32 = arith.constant 0 : i32
    return %arg0, %arg1 : i32, i32
  }
}

</mosaic_0001>

<bundles_post_ra>
// kernel: tpu_custom_call.1
= control target key start
LH: loop header
LB: loop body
LE: loop exit
PB: predicated region body
PF: predicated region fallthrough
CT: control target
= control target key end

     0   :  { %8 = vsyncpa [#allocation3], 0  ;;  %s389_s0 = inlined_call_operand.hbm [shape: f32[8,128], index: 0, kind: input, shape index: {}]   ;;  %s390_s1 = inlined_call_operand.hbm [shape: f32[128,128], index: 1, kind: input, shape index: {}]   ;;  %s391_s2 = inlined_call_operand.vmem [shape: f32[1,128], index: 2, kind: input, shape index: {}]   ;;  %s392_s3 = inlined_call_operand.hbm [shape: f32[8,128], index: 3, kind: output, shape index: {}]  }
   0x1   :  { %9 = vsyncpa [#allocation6], 0 }
   0x2   :  { %10 = vsyncpa [#allocation4], 0  ;;  %s315_s12 = smov [#allocation2]   ;;  %s316_s14 = smov [#allocation5]  }
   0x3   :  { %s17_s13 = sshll.u32 %s315_s12, 4  ;;  %s26_s15 = sshll.u32 %s316_s14, 4  ;;  %s18_s13 = int_to_ptr.vmem [resolvable:$true] %s17_s13  ;;  %s343_s15 = int_to_ptr.vmem [resolvable:$true] %s26_s15 }
   0x4   :  { %s243_s18 = scalar_lea.hbm %s389_s0, 128 }
   0x5   :  { %p244_p0 = scmp.ne.s32.totalorder %s389_s0, %s243_s18  ;;  %p247_p1 = scmp.lt.u32.totalorder %s243_s18, %s389_s0 }
   0x7   :  { %p249_p2 = pnand %p247_p1, %p244_p0 }
   0x9   :  { %252 = shalt.err (!%p249_p2)
}
   0xa   :  { %s253_s23 = scalar_lea.vmem %s18_s13, 128  ;;  %p258_p4 = scmp.lt.s32.totalorder %s18_s13, %s18_s13 }
   0xb   :  { %p254_p3 = scmp.ne.s32.totalorder %s18_s13, %s253_s23  ;;  %p259_p5 = scmp.lt.s32.totalorder %s253_s23, %s253_s23 }
   0xd   :  { %p260_p6 = por %p259_p5, %p258_p4 }
   0xf   :  { %p261_p7 = pnand %p260_p6, %p254_p3 }
  0x11   :  { %264 = shalt.err (!%p261_p7)
}
  0x12   :  { %20 = dma.hbm_to_vmem [thread:$0]  %s389_s0, 128, %s18_s13, [#allocation3]  }
  0x13   :  { %s265_s28 = scalar_lea.hbm %s390_s1, 2048 }
  0x14   :  { %p266_p8 = scmp.ne.s32.totalorder %s390_s1, %s265_s28  ;;  %p269_p9 = scmp.lt.u32.totalorder %s265_s28, %s390_s1 }
  0x16   :  { %p271_p10 = pnand %p269_p9, %p266_p8 }
  0x18   :  { %274 = shalt.err (!%p271_p10)
}
  0x19   :  { %s275_s6 = scalar_lea.vmem %s343_s15, 2048  ;;  %p280_p12 = scmp.lt.s32.totalorder %s343_s15, %s343_s15 }
  0x1a   :  { %p276_p11 = scmp.ne.s32.totalorder %s343_s15, %s275_s6  ;;  %p281_p13 = scmp.lt.s32.totalorder %s275_s6, %s275_s6 }
  0x1c   :  { %p282_p0 = por %p281_p13, %p280_p12 }
  0x1e   :  { %p283_p1 = pnand %p282_p0, %p276_p11 }
  0x20   :  { %286 = shalt.err (!%p283_p1)
}
  0x21   :  { %s317_s0 = smov 128   ;;  %s318_s7 = smov 8  }
  0x22   :  { %32 = dma.hbm_to_vmem [thread:$0]  %s390_s1, 2048, %s343_s15, [#allocation6], %s317_s0, %s317_s0, %s318_s7  }
  0x23   :  { %309 = dma.done.wait [#allocation3], 128  }
  0x24   :  { %310 = vsyncadd [#allocation3], 4294967168 }
  0x25   :  { %311 = dma.done.wait [#allocation6], 2048  }
  0x26   :  { %312 = vsyncadd [#allocation6], 4294965248  ;;  %v319_v0 = vmov 0.0|0.0   ;;  %vm320_vm0 = vmmov 0   ;;  %v321_v1 = vmov 0.0   ;;  %v42_v2 = vld [vmem:[#allocation5] sm:$0xff] }
  0x27   :  { %209 = vmatprep.subr.bf16.mxu0 %v319_v0  ;;  %206 = vmatprep.mubr.msk.f32.mxu0 %vm320_vm0, %v321_v1  ;;  %v43_v3 = vld [vmem:[#allocation5 + $0x8] sm:$0xff]  ;;  %v44_v4 = vld [vmem:[#allocation5 + $0x10] sm:$0xff]  ;;  %v45_v6 = vld [vmem:[#allocation5 + $0x18] sm:$0xff]  ;;  %s322_s11 = smov [#allocation7]  }
  0x28   :  { %v210_v5 = vpack.c.bf16 %v43_v3, %v42_v2  ;;  %v213_v7 = vpack.c.bf16 %v45_v6, %v44_v4  ;;  %v46_v8 = vld [vmem:[#allocation5 + $0x20] sm:$0xff]  ;;  %v47_v9 = vld [vmem:[#allocation5 + $0x28] sm:$0xff]  ;;  %v48_v11 = vld [vmem:[#allocation5 + $0x30] sm:$0xff]  ;;  %s146_s12 = sshll.u32 %s322_s11, 4  ;;  %s147_s12 = int_to_ptr.vmem [resolvable:$true] %s146_s12 }
  0x29   :  { %v216_v10 = vpack.c.bf16 %v47_v9, %v46_v8  ;;  %v49_v12 = vld [vmem:[#allocation5 + $0x38] sm:$0xff]  ;;  %v50_v14 = vld [vmem:[#allocation5 + $0x40] sm:$0xff]  ;;  %v51_v15 = vld [vmem:[#allocation5 + $0x48] sm:$0xff]  ;;  %s287_s13 = scalar_lea.vmem %s147_s12, 128  ;;  %p292_p3 = scmp.lt.s32.totalorder %s147_s12, %s147_s12 }
  0x2a   :  { %211 = vmatpush3.bf16.msra.mxu0 %v210_v5  ;;  %v219_v13 = vpack.c.bf16 %v49_v12, %v48_v11  ;;  %v222_v16 = vpack.c.bf16 %v51_v15, %v50_v14  ;;  %v52_v17 = vld [vmem:[#allocation5 + $0x50] sm:$0xff]  ;;  %v53_v18 = vld [vmem:[#allocation5 + $0x58] sm:$0xff]  ;;  %v54_v20 = vld [vmem:[#allocation5 + $0x60] sm:$0xff]  ;;  %p288_p2 = scmp.ne.s32.totalorder %s147_s12, %s287_s13  ;;  %p293_p4 = scmp.lt.s32.totalorder %s287_s13, %s287_s13 }
  0x2b   :  { %212 = vmatprep.subr.bf16.mxu0 %v319_v0  ;;  %v225_v19 = vpack.c.bf16 %v53_v18, %v52_v17  ;;  %v55_v21 = vld [vmem:[#allocation5 + $0x68] sm:$0xff]  ;;  %v56_v23 = vld [vmem:[#allocation5 + $0x70] sm:$0xff]  ;;  %v57_v24 = vld [vmem:[#allocation5 + $0x78] sm:$0xff] }
  0x2c   :  { %v228_v22 = vpack.c.bf16 %v55_v21, %v54_v20  ;;  %v231_v25 = vpack.c.bf16 %v57_v24, %v56_v23  ;;  %v41_v26 = vld [vmem:[#allocation2] sm:$0xff]  ;;  %p294_p5 = por %p293_p4, %p292_p3 }
  0x2d   :  { %v156_v27 = vld [vmem:[%s391_s2] ss:$0 sm:$0xff] }
  0x2e   :  { %214 = vmatpush3.bf16.msra.mxu0 %v213_v7  ;;  %p295_p6 = pnand %p294_p5, %p288_p2 }
  0x2f   :  { %215 = vmatprep.subr.bf16.mxu0 %v319_v0 }
  0x32   :  { %217 = vmatpush3.bf16.msra.mxu0 %v216_v10 }
  0x33   :  { %218 = vmatprep.subr.bf16.mxu0 %v319_v0 }
  0x36   :  { %220 = vmatpush3.bf16.msra.mxu0 %v219_v13 }
  0x37   :  { %221 = vmatprep.subr.bf16.mxu0 %v319_v0 }
  0x3a   :  { %223 = vmatpush3.bf16.msra.mxu0 %v222_v16 }
  0x3b   :  { %224 = vmatprep.subr.bf16.mxu0 %v319_v0 }
  0x3e   :  { %226 = vmatpush3.bf16.msra.mxu0 %v225_v19 }
  0x3f   :  { %227 = vmatprep.subr.bf16.mxu0 %v319_v0 }
  0x42   :  { %229 = vmatpush3.bf16.msra.mxu0 %v228_v22 }
  0x43   :  { %230 = vmatprep.subr.bf16.mxu0 %v319_v0 }
  0x46   :  { %232 = vmatpush3.bf16.msra.mxu0 %v231_v25 }
  0x49   :  { %207 = vmatmul.mubr.f32.vlgmr.msra.gmra.mrb[0].mxu0 %v41_v26 }
 0x11c   :  { %v131_v28 = vpop.f32.mrb[0].mxu0 }
 0x11d   :  { %v132_v29 = vadd.f32 %v156_v27, %v131_v28  ;;  %v208_v30 = vpop.f32.mrb[1].mxu0 }
 0x11f   :  { %v135_v31 = vmax.f32 %v132_v29, 0.0 }
 0x121   :  { %v136_v32 = vsub.f32 0.0, %v135_v31 }
 0x123   :  { %v137_v33 = vmul.f32 1.442695, %v136_v32 }
 0x125   :  { %241 = vpow2.f32 %v137_v33 }
 0x12f   :  { %v242_v34 = vpop.eup %241 }
 0x130   :  { %139 = vst [vmem:[#allocation7] sm:$0xff] %v242_v34 }
 0x131   :  { %298 = shalt.err (!%p295_p6)
}
 0x132   :  { %s299_s15 = scalar_lea.hbm %s392_s3, 128 }
 0x133   :  { %p300_p7 = scmp.ne.s32.totalorder %s392_s3, %s299_s15  ;;  %p303_p8 = scmp.lt.u32.totalorder %s299_s15, %s392_s3 }
 0x135   :  { %p305_p9 = pnand %p303_p8, %p300_p7 }
 0x137   :  { %308 = shalt.err (!%p305_p9)
}
 0x138   :  { %149 = dma.vmem_to_hbm [thread:$0]  %s147_s12, 128, %s392_s3, [#allocation4]  }
 0x139   :  { %313 = dma.done.wait [#allocation4], 128  }
 0x13a   :  { %314 = vsyncadd [#allocation4], 4294967168 }
 0x13b   :  { %153 = vsyncpa [#allocation3], 1 }
 0x13c   :  { %154 = vsyncpa [#allocation6], 1 }
 0x13d   :  { %155 = vsyncpa [#allocation4], 1 }

</bundles_post_ra>
